<compile_context>
chip_gen: v6e
topology: v6e:2x2x1
jax: 0.10.0
libtpu: 0.0.40
codegen_flags: <defaults>
</compile_context>

<pallas_src>
import functools

import jax
import jax.numpy as jnp
from jax.experimental import pallas as pl
from jax.experimental.pallas import tpu as pltpu

EPS = 1e-6

# Cast MXU operands to this dtype. Set to jnp.bfloat16 to double MXU throughput and
# halve VMEM/HBM traffic at large sizes; kept f32 here so the small demo matches the
# f32 reference within a tight tolerance.
COMPUTE_DTYPE = jnp.float32


# ------------------------------ in-kernel helpers ------------------------------

def _mm(a, b):
    return jnp.dot(a.astype(COMPUTE_DTYPE), b.astype(COMPUTE_DTYPE),
                   preferred_element_type=jnp.float32)


def _rms(x, w):
    # T5LayerNorm == RMSNorm: x * rsqrt(mean(x^2) + eps) * weight
    var = jnp.mean(x * x, axis=-1, keepdims=True)
    return x * jax.lax.rsqrt(var + EPS) * w


# ------------------------------- Pallas kernels --------------------------------

def _attn_layer_kernel(x_ref, kv_ref, ln_ref, wq_ref, wk_ref, wv_ref, wo_ref, o_ref,
                       *, num_heads, d_kv, cross):
    """Fused T5LayerSelfAttention / T5LayerCrossAttention for one (batch, q-tile)."""
    x = x_ref[0]                           # [tq, D]  query-side residual input
    w_ln = ln_ref[...]                     # [1, D]
    xn = _rms(x, w_ln)                     # RMSNorm prologue fused with projections

    if cross:
        kvn = kv_ref[0]                    # encoder states are NOT layernormed (T5)
    else:
        kvn = _rms(kv_ref[0], w_ln)        # self-attn keys/values from normed hidden

    q = _mm(xn, wq_ref[...])               # [tq, H*d_kv]
    k = _mm(kvn, wk_ref[...])              # [Sk, H*d_kv]
    v = _mm(kvn, wv_ref[...])              # [Sk, H*d_kv]

    attn = None
    for h in range(num_heads):             # static unroll; heads via lane slices
        lo = h * d_kv
        qh = q[:, lo:lo + d_kv]
        kh = k[:, lo:lo + d_kv]
        vh = v[:, lo:lo + d_kv]
        # T5: no 1/sqrt(d_kv) scaling; mask / position_bias are None => no bias add.
        s = jax.lax.dot_general(
            qh.astype(COMPUTE_DTYPE), kh.astype(COMPUTE_DTYPE),
            (((1,), (1,)), ((), ())),
            preferred_element_type=jnp.float32)          # [tq, Sk]
        s = s - jnp.max(s, axis=-1, keepdims=True)
        p = jnp.exp(s)
        p = p * pl.reciprocal(jnp.sum(p, axis=-1, keepdims=True), approx=True)
        ctx_h = _mm(p, vh)                               # [tq, d_kv]
        part = _mm(ctx_h, wo_ref[lo:lo + d_kv, :])       # [tq, D] output-proj slice
        attn = part if attn is None else attn + part

    o_ref[0] = x + attn                    # residual add fused (dropout = identity)


def _ff_layer_kernel(x_ref, ln_ref, wi_ref, wo_ref, o_ref, acc_ref):
    """Fused T5LayerFF; d_ff axis tiled on grid axis 2 and accumulated in VMEM."""
    f = pl.program_id(2)

    x = x_ref[0]                           # [tr, D]

    @pl.when(f == 0)
    def _():
        acc_ref[...] = x                   # initialize accumulator with the residual

    xn = _rms(x, ln_ref[...])
    h = jnp.maximum(_mm(xn, wi_ref[...]), 0.0)           # [tr, tf]
    acc_ref[...] += _mm(h, wo_ref[...])                  # accumulate over d_ff tiles

    @pl.when(f == pl.num_programs(2) - 1)
    def _():
        o_ref[0] = acc_ref[...]


# ------------------------------- layer wrappers --------------------------------

def _row_tile(s):
    return 128 if (s > 128 and s % 128 == 0) else s


def _ff_tile(f):
    return 512 if (f > 512 and f % 512 == 0) else f


def t5_attention_layer(hidden, kv_states, ap, num_heads, d_kv, *, cross):
    """One fused pallas_call for a T5 self- or cross-attention sub-layer."""
    B, Sq, D = hidden.shape
    inner = num_heads * d_kv
    kv = kv_states if cross else hidden
    Sk = kv.shape[1]
    tq = _row_tile(Sq)

    kernel = functools.partial(_attn_layer_kernel,
                               num_heads=num_heads, d_kv=d_kv, cross=cross)
    return pl.pallas_call(
        kernel,
        out_shape=jax.ShapeDtypeStruct((B, Sq, D), jnp.float32),
        grid=(B, Sq // tq),
        in_specs=[
            pl.BlockSpec((1, tq, D), lambda b, qi: (b, qi, 0)),   # query-side hidden
            pl.BlockSpec((1, Sk, D), lambda b, qi: (b, 0, 0)),    # kv source (full seq)
            pl.BlockSpec((1, D), lambda b, qi: (0, 0)),           # RMSNorm weight
            pl.BlockSpec((D, inner), lambda b, qi: (0, 0)),       # Wq
            pl.BlockSpec((D, inner), lambda b, qi: (0, 0)),       # Wk
            pl.BlockSpec((D, inner), lambda b, qi: (0, 0)),       # Wv
            pl.BlockSpec((inner, D), lambda b, qi: (0, 0)),       # Wo
        ],
        out_specs=pl.BlockSpec((1, tq, D), lambda b, qi: (b, qi, 0)),
        compiler_params=pltpu.CompilerParams(
            dimension_semantics=("parallel", "parallel")),
    )(hidden, kv, ap["ln"].reshape(1, D), ap["q"], ap["k"], ap["v"], ap["o"])


def t5_ff_layer(hidden, fp):
    """One fused pallas_call for T5LayerFF with d_ff tiling (bounded VMEM on v7x)."""
    B, S, D = hidden.shape
    F = fp["wi"].shape[1]
    tr = _row_tile(S)
    tf = _ff_tile(F)

    return pl.pallas_call(
        _ff_layer_kernel,
        out_shape=jax.ShapeDtypeStruct((B, S, D), jnp.float32),
        grid=(B, S // tr, F // tf),
        in_specs=[
            pl.BlockSpec((1, tr, D), lambda b, r, f: (b, r, 0)),  # hidden (residual)
            pl.BlockSpec((1, D), lambda b, r, f: (0, 0)),         # RMSNorm weight
            pl.BlockSpec((D, tf), lambda b, r, f: (0, f)),        # wi tile
            pl.BlockSpec((tf, D), lambda b, r, f: (f, 0)),        # wo tile
        ],
        out_specs=pl.BlockSpec((1, tr, D), lambda b, r, f: (b, r, 0)),
        scratch_shapes=[pltpu.VMEM((tr, D), jnp.float32)],
        compiler_params=pltpu.CompilerParams(
            dimension_semantics=("parallel", "parallel", "arbitrary")),
    )(hidden, fp["ln"].reshape(1, D), fp["wi"], fp["wo"])


# ----------------------------- T5 block composition ----------------------------

def t5_decoder_block(hidden, encoder_hidden, params, num_heads, d_kv):
    h = t5_attention_layer(hidden, None, params["self_attn"], num_heads, d_kv,
                           cross=False)
    h = t5_attention_layer(h, encoder_hidden, params["cross_attn"], num_heads, d_kv,
                           cross=True)
    h = t5_ff_layer(h, params["ff"])
    # use_cache=False, output_attentions=False, has_relative_attention_bias=False
    # => the PyTorch forward returns a 1-tuple (hidden_states,)
    # TODO(synk): past_key_value caching / attention-weight outputs not implemented
    # (not exercised on this inference path).
    return (h,)


# ---------------------------------- reference -----------------------------------

def _ref_block(hidden, enc, params, num_heads, d_kv):
    def ln(x, w):
        var = jnp.mean(x * x, axis=-1, keepdims=True)
        return x * jax.lax.rsqrt(var + EPS) * w

    def attn(x, kv_states, ap):
        B, Sq, D = x.shape
        xn = ln(x, ap["ln"])
        kv = xn if kv_states is None else kv_states
        Sk = kv.shape[1]
        q = (xn @ ap["q"]).reshape(B, Sq, num_heads, d_kv).transpose(0, 2, 1, 3)
        k = (kv @ ap["k"]).reshape(B, Sk, num_heads, d_kv).transpose(0, 2, 1, 3)
        v = (kv @ ap["v"]).reshape(B, Sk, num_heads, d_kv).transpose(0, 2, 1, 3)
        s = jnp.einsum("bhqd,bhkd->bhqk", q, k)
        p = jax.nn.softmax(s, axis=-1)
        o = jnp.einsum("bhqk,bhkd->bhqd", p, v)
        o = o.transpose(0, 2, 1, 3).reshape(B, Sq, num_heads * d_kv)
        return x + o @ ap["o"]

    h = attn(hidden, None, params["self_attn"])
    h = attn(h, enc, params["cross_attn"])
    hn = ln(h, params["ff"]["ln"])
    h = h + jnp.maximum(hn @ params["ff"]["wi"], 0.0) @ params["ff"]["wo"]
    return h


# ------------------------------------ main ---------------------------------------

def init_params(key, d_model, num_heads, d_kv, d_ff):
    inner = num_heads * d_kv
    ks = jax.random.split(key, 12)
    n = lambda k, shp: (jax.random.normal(k, shp, jnp.float32) * 0.05)
    attn_p = lambda k0, k1, k2, k3: {
        "q": n(k0, (d_model, inner)), "k": n(k1, (d_model, inner)),
        "v": n(k2, (d_model, inner)), "o": n(k3, (inner, d_model)),
        "ln": jnp.ones((d_model,), jnp.float32),
    }
    return {
        "self_attn": attn_p(ks[0], ks[1], ks[2], ks[3]),
        "cross_attn": attn_p(ks[4], ks[5], ks[6], ks[7]),
        "ff": {"wi": n(ks[8], (d_model, d_ff)), "wo": n(ks[9], (d_ff, d_model)),
               "ln": jnp.ones((d_model,), jnp.float32)},
    }


if __name__ == "__main__":
    B, S_dec, S_enc = 2, 8, 8
    d_model, num_heads, d_kv, d_ff = 32, 4, 8, 64

    root = jax.random.PRNGKey(0)
    k_h, k_e, k_p = jax.random.split(root, 3)
    hidden = jax.random.normal(k_h, (B, S_dec, d_model), jnp.float32)
    encoder_hidden = jax.random.normal(k_e, (B, S_enc, d_model), jnp.float32)
    params = init_params(k_p, d_model, num_heads, d_kv, d_ff)

    outputs = t5_decoder_block(hidden, encoder_hidden, params, num_heads, d_kv)
    out = jax.block_until_ready(outputs[0])

    ref = _ref_block(hidden, encoder_hidden, params, num_heads, d_kv)
    assert out.shape == (B, S_dec, d_model)
    # Tolerance slightly relaxed vs 1e-4 because the softmax denominator uses the
    # EUP approximate reciprocal (pl.reciprocal(approx=True)).
    assert jnp.allclose(out, ref, atol=2e-3, rtol=2e-3), "mismatch vs JAX reference"
    print("KERNEL_OK")
</pallas_src>

<mosaic_0001>
module attributes {stable_mosaic.version = 11 : i64} {
  func.func @_attn_layer_kernel(%arg0: i32, %arg1: i32, %arg2: memref<1x8x32xf32, #tpu.memory_space<vmem>>, %arg3: memref<1x8x32xf32, #tpu.memory_space<vmem>>, %arg4: memref<1x32xf32, #tpu.memory_space<vmem>>, %arg5: memref<32x32xf32, #tpu.memory_space<vmem>>, %arg6: memref<32x32xf32, #tpu.memory_space<vmem>>, %arg7: memref<32x32xf32, #tpu.memory_space<vmem>>, %arg8: memref<32x32xf32, #tpu.memory_space<vmem>>, %arg9: memref<1x8x32xf32, #tpu.memory_space<vmem>>) attributes {dimension_semantics = [#tpu.dimension_semantics<parallel>, #tpu.dimension_semantics<parallel>], iteration_bounds = array<i64: 2, 1>, scalar_prefetch = 0 : i64, scratch_operands = 0 : i64, tpu.core_type = #tpu.core_type<tc>, window_params = [{transform_indices = @transform_0, window_bounds = array<i64: 1, 8, 32>}, {transform_indices = @transform_1, window_bounds = array<i64: 1, 8, 32>}, {pipeline_mode = #tpu.pipeline_mode<synchronous>, transform_indices = @transform_2, window_bounds = array<i64: 1, 32>}, {pipeline_mode = #tpu.pipeline_mode<synchronous>, transform_indices = @transform_3, window_bounds = array<i64: 32, 32>}, {pipeline_mode = #tpu.pipeline_mode<synchronous>, transform_indices = @transform_4, window_bounds = array<i64: 32, 32>}, {pipeline_mode = #tpu.pipeline_mode<synchronous>, transform_indices = @transform_5, window_bounds = array<i64: 32, 32>}, {pipeline_mode = #tpu.pipeline_mode<synchronous>, transform_indices = @transform_6, window_bounds = array<i64: 32, 32>}, {transform_indices = @transform_7, window_bounds = array<i64: 1, 8, 32>}]} {
    %c0 = arith.constant 0 : index
    %c0_0 = arith.constant 0 : index
    %c0_1 = arith.constant 0 : index
    %0 = vector.load %arg2[%c0, %c0_0, %c0_1] : memref<1x8x32xf32, #tpu.memory_space<vmem>>, vector<1x8x32xf32>
    %1 = vector.shape_cast %0 : vector<1x8x32xf32> to vector<8x32xf32>
    %c0_2 = arith.constant 0 : index
    %c0_3 = arith.constant 0 : index
    %2 = vector.load %arg4[%c0_2, %c0_3] : memref<1x32xf32, #tpu.memory_space<vmem>>, vector<1x32xf32>
    %3 = arith.mulf %1, %1 : vector<8x32xf32>
    %cst = arith.constant dense<0.000000e+00> : vector<8xf32>
    %4 = vector.multi_reduction <add>, %3, %cst [1] : vector<8x32xf32> to vector<8xf32>
    %5 = vector.shape_cast %4 : vector<8xf32> to vector<8x1xf32>
    %cst_4 = arith.constant 3.200000e+01 : f32
    %6 = vector.broadcast %cst_4 : f32 to vector<8x1xf32>
    %7 = arith.divf %5, %6 : vector<8x1xf32>
    %cst_5 = arith.constant 9.99999997E-7 : f32
    %8 = vector.broadcast %cst_5 : f32 to vector<8x1xf32>
    %9 = arith.addf %7, %8 : vector<8x1xf32>
    %10 = math.rsqrt %9 : vector<8x1xf32>
    %11 = vector.broadcast %10 : vector<8x1xf32> to vector<8x32xf32>
    %12 = arith.mulf %1, %11 : vector<8x32xf32>
    %13 = vector.broadcast %2 : vector<1x32xf32> to vector<8x32xf32>
    %14 = arith.mulf %12, %13 : vector<8x32xf32>
    %c0_6 = arith.constant 0 : index
    %c0_7 = arith.constant 0 : index
    %c0_8 = arith.constant 0 : index
    %15 = vector.load %arg3[%c0_6, %c0_7, %c0_8] : memref<1x8x32xf32, #tpu.memory_space<vmem>>, vector<1x8x32xf32>
    %16 = vector.shape_cast %15 : vector<1x8x32xf32> to vector<8x32xf32>
    %17 = arith.mulf %16, %16 : vector<8x32xf32>
    %cst_9 = arith.constant dense<0.000000e+00> : vector<8xf32>
    %18 = vector.multi_reduction <add>, %17, %cst_9 [1] : vector<8x32xf32> to vector<8xf32>
    %19 = vector.shape_cast %18 : vector<8xf32> to vector<8x1xf32>
    %cst_10 = arith.constant 3.200000e+01 : f32
    %20 = vector.broadcast %cst_10 : f32 to vector<8x1xf32>
    %21 = arith.divf %19, %20 : vector<8x1xf32>
    %cst_11 = arith.constant 9.99999997E-7 : f32
    %22 = vector.broadcast %cst_11 : f32 to vector<8x1xf32>
    %23 = arith.addf %21, %22 : vector<8x1xf32>
    %24 = math.rsqrt %23 : vector<8x1xf32>
    %25 = vector.broadcast %24 : vector<8x1xf32> to vector<8x32xf32>
    %26 = arith.mulf %16, %25 : vector<8x32xf32>
    %27 = vector.broadcast %2 : vector<1x32xf32> to vector<8x32xf32>
    %28 = arith.mulf %26, %27 : vector<8x32xf32>
    %c0_12 = arith.constant 0 : index
    %c0_13 = arith.constant 0 : index
    %29 = vector.load %arg5[%c0_12, %c0_13] : memref<32x32xf32, #tpu.memory_space<vmem>>, vector<32x32xf32>
    %cst_14 = arith.constant dense<0.000000e+00> : vector<8x32xf32>
    %30 = tpu.matmul %14, %29, %cst_14 {dimension_numbers = #tpu.dot_dimension_numbers<[1], [0], [0], [1], [0, 0, 1, 1], [], []>} : vector<8x32xf32>, vector<32x32xf32>, vector<8x32xf32> -> vector<8x32xf32>
    %c0_15 = arith.constant 0 : index
    %c0_16 = arith.constant 0 : index
    %31 = vector.load %arg6[%c0_15, %c0_16] : memref<32x32xf32, #tpu.memory_space<vmem>>, vector<32x32xf32>
    %cst_17 = arith.constant dense<0.000000e+00> : vector<8x32xf32>
    %32 = tpu.matmul %28, %31, %cst_17 {dimension_numbers = #tpu.dot_dimension_numbers<[1], [0], [0], [1], [0, 0, 1, 1], [], []>} : vector<8x32xf32>, vector<32x32xf32>, vector<8x32xf32> -> vector<8x32xf32>
    %c0_18 = arith.constant 0 : index
    %c0_19 = arith.constant 0 : index
    %33 = vector.load %arg7[%c0_18, %c0_19] : memref<32x32xf32, #tpu.memory_space<vmem>>, vector<32x32xf32>
    %cst_20 = arith.constant dense<0.000000e+00> : vector<8x32xf32>
    %34 = tpu.matmul %28, %33, %cst_20 {dimension_numbers = #tpu.dot_dimension_numbers<[1], [0], [0], [1], [0, 0, 1, 1], [], []>} : vector<8x32xf32>, vector<32x32xf32>, vector<8x32xf32> -> vector<8x32xf32>
    %35 = vector.extract_strided_slice %30 {offsets = [0, 0], sizes = [8, 8], strides = [1, 1]} : vector<8x32xf32> to vector<8x8xf32>
    %36 = vector.extract_strided_slice %32 {offsets = [0, 0], sizes = [8, 8], strides = [1, 1]} : vector<8x32xf32> to vector<8x8xf32>
    %37 = vector.extract_strided_slice %34 {offsets = [0, 0], sizes = [8, 8], strides = [1, 1]} : vector<8x32xf32> to vector<8x8xf32>
    %cst_21 = arith.constant dense<0.000000e+00> : vector<8x8xf32>
    %38 = tpu.matmul %35, %36, %cst_21 {dimension_numbers = #tpu.dot_dimension_numbers<[1], [1], [0], [0], [0, 0, 1, 0], [], []>} : vector<8x8xf32>, vector<8x8xf32>, vector<8x8xf32> -> vector<8x8xf32>
    %cst_22 = arith.constant dense<0xFF800000> : vector<8xf32>
    %39 = vector.multi_reduction <maximumf>, %38, %cst_22 [1] : vector<8x8xf32> to vector<8xf32>
    %40 = vector.shape_cast %39 : vector<8xf32> to vector<8x1xf32>
    %41 = vector.broadcast %40 : vector<8x1xf32> to vector<8x8xf32>
    %42 = arith.subf %38, %41 : vector<8x8xf32>
    %43 = math.exp %42 : vector<8x8xf32>
    %cst_23 = arith.constant dense<0.000000e+00> : vector<8xf32>
    %44 = vector.multi_reduction <add>, %43, %cst_23 [1] : vector<8x8xf32> to vector<8xf32>
    %45 = vector.shape_cast %44 : vector<8xf32> to vector<8x1xf32>
    %46 = tpu.reciprocal %45 {approx = true} : vector<8x1xf32> -> vector<8x1xf32>
    %47 = vector.broadcast %46 : vector<8x1xf32> to vector<8x8xf32>
    %48 = arith.mulf %43, %47 : vector<8x8xf32>
    %cst_24 = arith.constant dense<0.000000e+00> : vector<8x8xf32>
    %49 = tpu.matmul %48, %37, %cst_24 {dimension_numbers = #tpu.dot_dimension_numbers<[1], [0], [0], [1], [0, 0, 1, 1], [], []>} : vector<8x8xf32>, vector<8x8xf32>, vector<8x8xf32> -> vector<8x8xf32>
    %c0_25 = arith.constant 0 : index
    %c0_26 = arith.constant 0 : index
    %50 = vector.load %arg8[%c0_25, %c0_26] : memref<32x32xf32, #tpu.memory_space<vmem>>, vector<8x32xf32>
    %cst_27 = arith.constant dense<0.000000e+00> : vector<8x32xf32>
    %51 = tpu.matmul %49, %50, %cst_27 {dimension_numbers = #tpu.dot_dimension_numbers<[1], [0], [0], [1], [0, 0, 1, 1], [], []>} : vector<8x8xf32>, vector<8x32xf32>, vector<8x32xf32> -> vector<8x32xf32>
    %52 = vector.extract_strided_slice %30 {offsets = [0, 8], sizes = [8, 8], strides = [1, 1]} : vector<8x32xf32> to vector<8x8xf32>
    %53 = vector.extract_strided_slice %32 {offsets = [0, 8], sizes = [8, 8], strides = [1, 1]} : vector<8x32xf32> to vector<8x8xf32>
    %54 = vector.extract_strided_slice %34 {offsets = [0, 8], sizes = [8, 8], strides = [1, 1]} : vector<8x32xf32> to vector<8x8xf32>
    %cst_28 = arith.constant dense<0.000000e+00> : vector<8x8xf32>
    %55 = tpu.matmul %52, %53, %cst_28 {dimension_numbers = #tpu.dot_dimension_numbers<[1], [1], [0], [0], [0, 0, 1, 0], [], []>} : vector<8x8xf32>, vector<8x8xf32>, vector<8x8xf32> -> vector<8x8xf32>
    %cst_29 = arith.constant dense<0xFF800000> : vector<8xf32>
    %56 = vector.multi_reduction <maximumf>, %55, %cst_29 [1] : vector<8x8xf32> to vector<8xf32>
    %57 = vector.shape_cast %56 : vector<8xf32> to vector<8x1xf32>
    %58 = vector.broadcast %57 : vector<8x1xf32> to vector<8x8xf32>
    %59 = arith.subf %55, %58 : vector<8x8xf32>
    %60 = math.exp %59 : vector<8x8xf32>
    %cst_30 = arith.constant dense<0.000000e+00> : vector<8xf32>
    %61 = vector.multi_reduction <add>, %60, %cst_30 [1] : vector<8x8xf32> to vector<8xf32>
    %62 = vector.shape_cast %61 : vector<8xf32> to vector<8x1xf32>
    %63 = tpu.reciprocal %62 {approx = true} : vector<8x1xf32> -> vector<8x1xf32>
    %64 = vector.broadcast %63 : vector<8x1xf32> to vector<8x8xf32>
    %65 = arith.mulf %60, %64 : vector<8x8xf32>
    %cst_31 = arith.constant dense<0.000000e+00> : vector<8x8xf32>
    %66 = tpu.matmul %65, %54, %cst_31 {dimension_numbers = #tpu.dot_dimension_numbers<[1], [0], [0], [1], [0, 0, 1, 1], [], []>} : vector<8x8xf32>, vector<8x8xf32>, vector<8x8xf32> -> vector<8x8xf32>
    %c8 = arith.constant 8 : index
    %c0_32 = arith.constant 0 : index
    %67 = vector.load %arg8[%c8, %c0_32] : memref<32x32xf32, #tpu.memory_space<vmem>>, vector<8x32xf32>
    %cst_33 = arith.constant dense<0.000000e+00> : vector<8x32xf32>
    %68 = tpu.matmul %66, %67, %cst_33 {dimension_numbers = #tpu.dot_dimension_numbers<[1], [0], [0], [1], [0, 0, 1, 1], [], []>} : vector<8x8xf32>, vector<8x32xf32>, vector<8x32xf32> -> vector<8x32xf32>
    %69 = arith.addf %51, %68 : vector<8x32xf32>
    %70 = vector.extract_strided_slice %30 {offsets = [0, 16], sizes = [8, 8], strides = [1, 1]} : vector<8x32xf32> to vector<8x8xf32>
    %71 = vector.extract_strided_slice %32 {offsets = [0, 16], sizes = [8, 8], strides = [1, 1]} : vector<8x32xf32> to vector<8x8xf32>
    %72 = vector.extract_strided_slice %34 {offsets = [0, 16], sizes = [8, 8], strides = [1, 1]} : vector<8x32xf32> to vector<8x8xf32>
    %cst_34 = arith.constant dense<0.000000e+00> : vector<8x8xf32>
    %73 = tpu.matmul %70, %71, %cst_34 {dimension_numbers = #tpu.dot_dimension_numbers<[1], [1], [0], [0], [0, 0, 1, 0], [], []>} : vector<8x8xf32>, vector<8x8xf32>, vector<8x8xf32> -> vector<8x8xf32>
    %cst_35 = arith.constant dense<0xFF800000> : vector<8xf32>
    %74 = vector.multi_reduction <maximumf>, %73, %cst_35 [1] : vector<8x8xf32> to vector<8xf32>
    %75 = vector.shape_cast %74 : vector<8xf32> to vector<8x1xf32>
    %76 = vector.broadcast %75 : vector<8x1xf32> to vector<8x8xf32>
    %77 = arith.subf %73, %76 : vector<8x8xf32>
    %78 = math.exp %77 : vector<8x8xf32>
    %cst_36 = arith.constant dense<0.000000e+00> : vector<8xf32>
    %79 = vector.multi_reduction <add>, %78, %cst_36 [1] : vector<8x8xf32> to vector<8xf32>
    %80 = vector.shape_cast %79 : vector<8xf32> to vector<8x1xf32>
    %81 = tpu.reciprocal %80 {approx = true} : vector<8x1xf32> -> vector<8x1xf32>
    %82 = vector.broadcast %81 : vector<8x1xf32> to vector<8x8xf32>
    %83 = arith.mulf %78, %82 : vector<8x8xf32>
    %cst_37 = arith.constant dense<0.000000e+00> : vector<8x8xf32>
    %84 = tpu.matmul %83, %72, %cst_37 {dimension_numbers = #tpu.dot_dimension_numbers<[1], [0], [0], [1], [0, 0, 1, 1], [], []>} : vector<8x8xf32>, vector<8x8xf32>, vector<8x8xf32> -> vector<8x8xf32>
    %c16 = arith.constant 16 : index
    %c0_38 = arith.constant 0 : index
    %85 = vector.load %arg8[%c16, %c0_38] : memref<32x32xf32, #tpu.memory_space<vmem>>, vector<8x32xf32>
    %cst_39 = arith.constant dense<0.000000e+00> : vector<8x32xf32>
    %86 = tpu.matmul %84, %85, %cst_39 {dimension_numbers = #tpu.dot_dimension_numbers<[1], [0], [0], [1], [0, 0, 1, 1], [], []>} : vector<8x8xf32>, vector<8x32xf32>, vector<8x32xf32> -> vector<8x32xf32>
    %87 = arith.addf %69, %86 : vector<8x32xf32>
    %88 = vector.extract_strided_slice %30 {offsets = [0, 24], sizes = [8, 8], strides = [1, 1]} : vector<8x32xf32> to vector<8x8xf32>
    %89 = vector.extract_strided_slice %32 {offsets = [0, 24], sizes = [8, 8], strides = [1, 1]} : vector<8x32xf32> to vector<8x8xf32>
    %90 = vector.extract_strided_slice %34 {offsets = [0, 24], sizes = [8, 8], strides = [1, 1]} : vector<8x32xf32> to vector<8x8xf32>
    %cst_40 = arith.constant dense<0.000000e+00> : vector<8x8xf32>
    %91 = tpu.matmul %88, %89, %cst_40 {dimension_numbers = #tpu.dot_dimension_numbers<[1], [1], [0], [0], [0, 0, 1, 0], [], []>} : vector<8x8xf32>, vector<8x8xf32>, vector<8x8xf32> -> vector<8x8xf32>
    %cst_41 = arith.constant dense<0xFF800000> : vector<8xf32>
    %92 = vector.multi_reduction <maximumf>, %91, %cst_41 [1] : vector<8x8xf32> to vector<8xf32>
    %93 = vector.shape_cast %92 : vector<8xf32> to vector<8x1xf32>
    %94 = vector.broadcast %93 : vector<8x1xf32> to vector<8x8xf32>
    %95 = arith.subf %91, %94 : vector<8x8xf32>
    %96 = math.exp %95 : vector<8x8xf32>
    %cst_42 = arith.constant dense<0.000000e+00> : vector<8xf32>
    %97 = vector.multi_reduction <add>, %96, %cst_42 [1] : vector<8x8xf32> to vector<8xf32>
    %98 = vector.shape_cast %97 : vector<8xf32> to vector<8x1xf32>
    %99 = tpu.reciprocal %98 {approx = true} : vector<8x1xf32> -> vector<8x1xf32>
    %100 = vector.broadcast %99 : vector<8x1xf32> to vector<8x8xf32>
    %101 = arith.mulf %96, %100 : vector<8x8xf32>
    %cst_43 = arith.constant dense<0.000000e+00> : vector<8x8xf32>
    %102 = tpu.matmul %101, %90, %cst_43 {dimension_numbers = #tpu.dot_dimension_numbers<[1], [0], [0], [1], [0, 0, 1, 1], [], []>} : vector<8x8xf32>, vector<8x8xf32>, vector<8x8xf32> -> vector<8x8xf32>
    %c24 = arith.constant 24 : index
    %c0_44 = arith.constant 0 : index
    %103 = vector.load %arg8[%c24, %c0_44] : memref<32x32xf32, #tpu.memory_space<vmem>>, vector<8x32xf32>
    %cst_45 = arith.constant dense<0.000000e+00> : vector<8x32xf32>
    %104 = tpu.matmul %102, %103, %cst_45 {dimension_numbers = #tpu.dot_dimension_numbers<[1], [0], [0], [1], [0, 0, 1, 1], [], []>} : vector<8x8xf32>, vector<8x32xf32>, vector<8x32xf32> -> vector<8x32xf32>
    %105 = arith.addf %87, %104 : vector<8x32xf32>
    %106 = arith.addf %1, %105 : vector<8x32xf32>
    %c0_46 = arith.constant 0 : index
    %c0_47 = arith.constant 0 : index
    %c0_48 = arith.constant 0 : index
    %107 = vector.load %arg9[%c0_46, %c0_47, %c0_48] : memref<1x8x32xf32, #tpu.memory_space<vmem>>, vector<1x8x32xf32>
    %108 = vector.shape_cast %107 : vector<1x8x32xf32> to vector<8x32xf32>
    %109 = vector.shape_cast %106 : vector<8x32xf32> to vector<1x8x32xf32>
    tpu.vector_store %arg9[%c0_46, %c0_47, %c0_48], %109 {strides = array<i32>} : memref<1x8x32xf32, #tpu.memory_space<vmem>>, vector<1x8x32xf32>,
    return
  }
  func.func @transform_0(%arg0: i32, %arg1: i32) -> (i32, i32, i32) {
    %c0_i32 = arith.constant 0 : i32
    %c0_i32_0 = arith.constant 0 : i32
    return %arg0, %arg1, %c0_i32 : i32, i32, i32
  }
  func.func @transform_1(%arg0: i32, %arg1: i32) -> (i32, i32, i32) {
    %c0_i32 = arith.constant 0 : i32
    %c0_i32_0 = arith.constant 0 : i32
    %c0_i32_1 = arith.constant 0 : i32
    return %arg0, %c0_i32, %c0_i32_0 : i32, i32, i32
  }
  func.func @transform_2(%arg0: i32, %arg1: i32) -> (i32, i32) {
    %c0_i32 = arith.constant 0 : i32
    %c0_i32_0 = arith.constant 0 : i32
    %c0_i32_1 = arith.constant 0 : i32
    return %c0_i32, %c0_i32_0 : i32, i32
  }
  func.func @transform_3(%arg0: i32, %arg1: i32) -> (i32, i32) {
    %c0_i32 = arith.constant 0 : i32
    %c0_i32_0 = arith.constant 0 : i32
    %c0_i32_1 = arith.constant 0 : i32
    return %c0_i32, %c0_i32_0 : i32, i32
  }
  func.func @transform_4(%arg0: i32, %arg1: i32) -> (i32, i32) {
    %c0_i32 = arith.constant 0 : i32
    %c0_i32_0 = arith.constant 0 : i32
    %c0_i32_1 = arith.constant 0 : i32
    return %c0_i32, %c0_i32_0 : i32, i32
  }
  func.func @transform_5(%arg0: i32, %arg1: i32) -> (i32, i32) {
    %c0_i32 = arith.constant 0 : i32
    %c0_i32_0 = arith.constant 0 : i32
    %c0_i32_1 = arith.constant 0 : i32
    return %c0_i32, %c0_i32_0 : i32, i32
  }
  func.func @transform_6(%arg0: i32, %arg1: i32) -> (i32, i32) {
    %c0_i32 = arith.constant 0 : i32
    %c0_i32_0 = arith.constant 0 : i32
    %c0_i32_1 = arith.constant 0 : i32
    return %c0_i32, %c0_i32_0 : i32, i32
  }
  func.func @transform_7(%arg0: i32, %arg1: i32) -> (i32, i32, i32) {
    %c0_i32 = arith.constant 0 : i32
    %c0_i32_0 = arith.constant 0 : i32
    return %arg0, %arg1, %c0_i32 : i32, i32, i32
  }
}

</mosaic_0001>

<bundles_post_ra>
// kernel: tpu_custom_call.1
= control target key start
LH: loop header
LB: loop body
LE: loop exit
PB: predicated region body
PF: predicated region fallthrough
CT: control target
= control target key end

     0   :  { %s2752_s0 = inlined_call_operand.hbm [shape: f32[2,8,32], index: 0, kind: input, shape index: {}]   ;;  %s2753_s1 = inlined_call_operand.hbm [shape: f32[2,8,32], index: 1, kind: input, shape index: {}]   ;;  %s2754_s2 = inlined_call_operand.vmem [shape: f32[1,32], index: 2, kind: input, shape index: {}]   ;;  %s2755_s3 = inlined_call_operand.hbm [shape: f32[32,32], index: 3, kind: input, shape index: {}]   ;;  %s2756_s4 = inlined_call_operand.hbm [shape: f32[32,32], index: 4, kind: input, shape index: {}]   ;;  %s2757_s5 = inlined_call_operand.hbm [shape: f32[32,32], index: 5, kind: input, shape index: {}]   ;;  %s2758_s6 = inlined_call_operand.hbm [shape: f32[32,32], index: 6, kind: input, shape index: {}]   ;;  %s2759_s7 = inlined_call_operand.hbm [shape: f32[2,8,32], index: 7, kind: output, shape index: {}]  }
   0x1   :  { %2761 = sst [smem:[#allocation20_spill]] %s2752_s0 }
   0x2   :  { %2762 = sst [smem:[#allocation21_spill]] %s2755_s3 }
   0x3   :  { %2763 = sst [smem:[#allocation22_spill]] %s2756_s4 }
   0x4   :  { %2764 = sst [smem:[#allocation23_spill]] %s2757_s5 }
   0x5   :  { %2765 = sst [smem:[#allocation24_spill]] %s2758_s6 }
   0x6   :  { %12 = vsyncpa [#allocation3], 0 }
   0x7   :  { %14 = vsyncpa [#allocation3 + $0x1], 0 }
   0x8   :  { %15 = vsyncpa [#allocation6], 0 }
   0x9   :  { %17 = vsyncpa [#allocation6 + $0x1], 0 }
   0xa   :  { %18 = vsyncpa [#allocation9], 0 }
   0xb   :  { %19 = vsyncpa [#allocation12], 0 }
   0xc   :  { %20 = vsyncpa [#allocation4], 0 }
   0xd   :  { %22 = vsyncpa [#allocation4 + $0x1], 0  ;;  %s2399_s24 = smov 0   ;;  %s2401_s25 = smov 0  }
   0xe   :  { %s2403_s26 = smov 0   ;;  %s2405_s27 = smov 0  }
   0xf   :  { %s2407_s28 = smov 0   ;;  %s2409_s29 = smov 0  }
  0x10 LB: > { %s2430_s30 = sadd.s32 4294967295, %s2343_s29   ;;  %p1778_p0 = scmp.ge.s32.totalorder %s2343_s29, 1  ;;  %s2343_s29 = sphi %s2409_s29, %s28_s29   ;;  %s2339_s28 = sphi %s2407_s28, %s2789_s28   ;;  %s2335_s27 = sphi %s2405_s27, %s2788_s27   ;;  %s2331_s26 = sphi %s2403_s26, %s2787_s26   ;;  %s2327_s25 = sphi %s2401_s25, %s2786_s25   ;;  %s2323_s24 = sphi %s2399_s24, %s2785_s24  }
  0x11   : > { %p2760_p1 = scmp.eq.s32.totalorder %s2430_s30, 0  ;;  %p232_p2 = scmp.lt.s32.totalorder %s2343_s29, 3 }
  0x12   : > { %s2345_s9 = smov [#allocation7]   ;;  %s2346_s12 = smov [#allocation8]  }
  0x13   : > { %p2435_p3 = pnand %p1778_p0, %p232_p2  ;;  %s247_s10 = sshll.u32 %s2345_s9, 4  ;;  %s248_s10 = int_to_ptr.vmem [resolvable:$true] %s247_s10 }
  0x14   : > { %s260_s13 = sshll.u32 %s2346_s12, 4  ;;  %s2347_s14 = smov [#allocation10]   ;;  %s261_s13 = int_to_ptr.vmem [resolvable:$true] %s260_s13 }
  0x15   : > { %p1974_p4 = pneg %p2435_p3  ;;  %s273_s15 = sshll.u32 %s2347_s14, 4  ;;  %s274_s15 = int_to_ptr.vmem [resolvable:$true] %s273_s15 }
  0x16   : > { %s2098_s16 = scalar_lea.vmem %s248_s10, 512  ;;  %p2106_p11 = scmp.lt.s32.totalorder %s248_s10, %s248_s10 }
  0x17   : > { %p2444_p6 = pnand %p1974_p4, %p2760_p1  ;;  %p2099_p8 = scmp.ne.s32.totalorder %s248_s10, %s2098_s16 }
  0x18   : > { %p2107_p12 = scmp.lt.s32.totalorder %s2098_s16, %s2098_s16 }
  0x19   : > { %p2089_p7 = pneg %p2444_p6 }
  0x1a   : > { %p2108_p13 = por %p2107_p12, %p2106_p11 }
  0x1b   : > { %p2101_p9 = pnand %p2099_p8, %p2089_p7 }
  0x1d   : > { %p2102_p10 = pneg %p2101_p9 }
  0x1f   : > { %p2109_p0 = pnand %p2108_p13, %p2102_p10 }
  0x21   : > { %2112 = shalt.err (!%p2109_p0)
}
  0x22   : > { %s2348_s17 = smov 128   ;;  %s2349_s18 = smov 8  }
  0x23   : > { %s2768_s3 = sld [smem:[#allocation21_spill]]  ;;  %s2124_s21 = scalar_lea.vmem %s261_s13, 512 }
  0x24   : > { %p2125_p2 = scmp.ne.s32.totalorder %s261_s13, %s2124_s21  ;;  %p2132_p9 = scmp.lt.s32.totalorder %s261_s13, %s261_s13 }
  0x25   : > { %p2133_p10 = scmp.lt.s32.totalorder %s2124_s21, %s2124_s21 }
  0x26   : > { %p2127_p4 = pnand %p2125_p2, %p2089_p7 }
  0x27   : > { %p2134_p11 = por %p2133_p10, %p2132_p9 }
  0x28   : > { %p2128_p8 = pneg %p2127_p4 }
  0x29   : > { %1977 = dma.hbm_to_vmem [thread:$0]  (!%p2444_p6), %s2768_s3, 512, %s248_s10, [#allocation6], %s2348_s17, %s2348_s17, %s2349_s18  }
  0x2a   : > { %p2135_p12 = pnand %p2134_p11, %p2128_p8 }
  0x2c   : > { %2138 = shalt.err (!%p2135_p12)
}
  0x2d   : > { %s2769_s4 = sld [smem:[#allocation22_spill]]  ;;  %s2150_s9 = scalar_lea.vmem %s274_s15, 512 }
  0x2e   : > { %p2151_p13 = scmp.ne.s32.totalorder %s274_s15, %s2150_s9  ;;  %p2158_p4 = scmp.lt.s32.totalorder %s274_s15, %s274_s15 }
  0x2f   : > { %p2159_p8 = scmp.lt.s32.totalorder %s2150_s9, %s2150_s9 }
  0x30   : > { %p2153_p0 = pnand %p2151_p13, %p2089_p7 }
  0x31   : > { %p2160_p9 = por %p2159_p8, %p2158_p4 }
  0x32   : > { %p2154_p2 = pneg %p2153_p0 }
  0x33   : > { %1980 = dma.hbm_to_vmem [thread:$0]  (!%p2444_p6), %s2769_s4, 512, %s261_s13, [#allocation9], %s2348_s17, %s2348_s17, %s2349_s18  }
  0x34   : > { %p2161_p10 = pnand %p2160_p9, %p2154_p2 }
  0x36   : > { %2164 = shalt.err (!%p2161_p10)
}
  0x37   : > { %s2770_s5 = sld [smem:[#allocation23_spill]]  ;;  %s2350_s13 = smov [#allocation11]  }
  0x38   : > { %s286_s14 = sshll.u32 %s2350_s13, 4  ;;  %s287_s14 = int_to_ptr.vmem [resolvable:$true] %s286_s14 }
  0x39   : > { %s2176_s16 = scalar_lea.vmem %s287_s14, 512  ;;  %p2184_p0 = scmp.lt.s32.totalorder %s287_s14, %s287_s14 }
  0x3a   : > { %p2177_p11 = scmp.ne.s32.totalorder %s287_s14, %s2176_s16  ;;  %p2185_p2 = scmp.lt.s32.totalorder %s2176_s16, %s2176_s16 }
  0x3c   : > { %p2179_p12 = pnand %p2177_p11, %p2089_p7  ;;  %p2186_p4 = por %p2185_p2, %p2184_p0 }
  0x3d   : > { %1983 = dma.hbm_to_vmem [thread:$0]  (!%p2444_p6), %s2770_s5, 512, %s274_s15, [#allocation9], %s2348_s17, %s2348_s17, %s2349_s18  }
  0x3e   : > { %p2180_p13 = pneg %p2179_p12 }
  0x40   : > { %p2187_p8 = pnand %p2186_p4, %p2180_p13 }
  0x42   : > { %2190 = shalt.err (!%p2187_p8)
}
  0x43   : > { %s2771_s6 = sld [smem:[#allocation24_spill]]  ;;  %s1777_s11 = sadd.s32 4294967294, %s2343_s29  }
  0x44   : > { %s40_s20 = sadd.s32 1, %s2339_s28  ;;  %s49_s21 = sadd.s32 1, %s2331_s26 }
  0x45   : > { %p42_p7 = scmp.ge.s32.totalorder %s40_s20, 2  ;;  %p56_p9 = scmp.ne.s32.totalorder %s2331_s26, %s2327_s25 }
  0x46   : > { %p57_p10 = scmp.eq.s32.totalorder %s2343_s29, 0  ;;  %p62_p12 = scmp.ne.s32.totalorder %s2327_s25, %s2323_s24 }
  0x47   : > { %s2791_s20 = smov (%p42_p7, %s40_s20), 0  ;;  %p225_p4 = scmp.eq.s32.totalorder %s1777_s11, 1 }
  0x48   : > { %p2502_p11 = por %p57_p10, %p56_p9  ;;  %p2513_p0 = por %p2760_p1, %p62_p12 }
  0x49   : > { %1986 = dma.hbm_to_vmem [thread:$0]  (!%p2444_p6), %s2771_s6, 512, %s287_s14, [#allocation12], %s2348_s17, %s2348_s17, %s2349_s18  }
  0x4a   : > { %s44_s17 = ssub.s32 %s2339_s28, %s2791_s20  ;;  %p219_p6 = scmp.eq.s32.totalorder %s2430_s30, 1 }
  0x4b   : > { %p47_p13 = scmp.eq.s32.totalorder %s44_s17, 0  ;;  %p2524_p8 = por %p225_p4, %p62_p12 }
  0x4c   : > { %p2517_p2 = por %p219_p6, %p56_p9  ;;  %p2002_p7 = scmp.lt.s32.totalorder %s2343_s29, 2 }
  0x4d   : > { %s2522_s9 = scalar_select %p47_p13, %s2331_s26, %s49_s21  }
  0x4e   : > { %s300_s12 = sand.u32 1, %s2331_s26   ;;  %s1785_s13 = sshll.u32 %s2339_s28, 7 }
  0x4f   : > { %s1784_s14 = sshll.u32 %s300_s12, 3  ;;  %s2776_s0 = sld [smem:[#allocation20_spill]] }
  0x50   : > { %s304_s17 = scalar_lea.vmem [#allocation2], %s1784_s14  ;;  %p2536_p9 = pnand %p2002_p7, %p2502_p11 }
  0x51   : > { %s312_s3 = sshll.u32 %s304_s17, 4  ;;  %s2543_s5 = scalar_lea.hbm %s2753_s1, %s1785_s13  ;;  %s313_s3 = int_to_ptr.vmem [resolvable:$true] %s312_s3 }
  0x52   : > { %s301_s6 = scalar_lea.sflag [#allocation3], %s300_s12  ;;  %p2193_p10 = pneg %p2536_p9 }
  0x53   : > { %s2204_s16 = scalar_lea.vmem %s313_s3, 128  ;;  %s2351_s22 = smov [#allocation2]  }
  0x54   : > { %p2205_p12 = scmp.ne.s32.totalorder %s313_s3, %s2204_s16  ;;  %s2209_s15 = sshll.u32 %s2351_s22, 4  ;;  %s2210_s15 = int_to_ptr.vmem [resolvable:$false] %s2209_s15 }
  0x55   : > { %s310_s19 = scalar_lea.hbm %s2776_s0, %s1785_s13  ;;  %s2211_s17 = scalar_lea.vmem %s2210_s15, 256 }
  0x56   : > { %p2207_p6 = pnand %p2205_p12, %p2193_p10  ;;  %p2212_p13 = scmp.lt.s32.totalorder %s313_s3, %s2210_s15 }
  0x57   : > { %p2213_p4 = scmp.lt.s32.totalorder %s2211_s17, %s2204_s16 }
  0x58   : > { %p2208_p11 = pneg %p2207_p6 }
  0x59   : > { %p2214_p7 = por %p2213_p4, %p2212_p13 }
  0x5b   : > { %p2215_p5 = pnand %p2214_p7, %p2208_p11 }
  0x5d   : > { %2218 = shalt.err (!%p2215_p5)
}
  0x5e   : > { %1990 = dma.hbm_to_vmem [thread:$0]  (!%p2536_p9), %s310_s19, 128, %s313_s3, %s301_s6  }
  0x5f   : > { %s319_s12 = sand.u32 1, %s2343_s29   ;;  %s323_s13 = scalar_lea.vmem [#allocation5], %s1784_s14 }
  0x60   : > { %s330_s11 = sshll.u32 %s323_s13, 4  ;;  %s320_s21 = scalar_lea.sflag [#allocation6], %s319_s12  ;;  %s331_s11 = int_to_ptr.vmem [resolvable:$true] %s330_s11 }
  0x61   : > { %s2232_s0 = scalar_lea.vmem %s331_s11, 128  ;;  %s2352_s16 = smov [#allocation5]  }
  0x62   : > { %p2233_p12 = scmp.ne.s32.totalorder %s331_s11, %s2232_s0  ;;  %s2237_s22 = sshll.u32 %s2352_s16, 4  ;;  %s2238_s22 = int_to_ptr.vmem [resolvable:$false] %s2237_s22 }
  0x63   : > { %s2239_s15 = scalar_lea.vmem %s2238_s22, 256  ;;  %p2240_p5 = scmp.lt.s32.totalorder %s331_s11, %s2238_s22 }
  0x64   : > { %p2235_p6 = pnand %p2233_p12, %p2193_p10  ;;  %p2241_p11 = scmp.lt.s32.totalorder %s2239_s15, %s2232_s0 }
  0x66   : > { %p2236_p1 = pneg %p2235_p6  ;;  %p2242_p13 = por %p2241_p11, %p2240_p5 }
  0x68   : > { %p2243_p4 = pnand %p2242_p13, %p2236_p1 }
  0x6a   : > { %2246 = shalt.err (!%p2243_p4)
}
  0x6b   : > { %1993 = dma.hbm_to_vmem [thread:$0]  (!%p2536_p9), %s2543_s5, 128, %s331_s11, %s320_s21  }
  0x6c   : > { %339 = sbr.rel (%p2435_p3) target bundleno = 2721 (0xaa1), region = 48  ;;  %s2562_s3 = sand.u32 (!%p2435_p3), 1, %s2327_s25  }
  0x6d   : > { %s2565_s6 = sshll.u32 (!%p2435_p3), %s2562_s3, 3  ;;  %s342_s0 = scalar_lea.sflag (!%p2435_p3), [#allocation3], %s2562_s3 }
  0x6e   : > { %s345_s14 = scalar_lea.vmem (!%p2435_p3), [#allocation2], %s2565_s6 }
  0x71   : > { %2298 = dma.done.wait (%p2513_p0), %s342_s0, 128  }
  0x72   : > { %2300 = vsyncadd (%p2513_p0), %s342_s0, 4294967168  ;;  %s350_s4 = sand.u32 1, %s2430_s30   ;;  %s354_s8 = scalar_lea.vmem [#allocation5], %s2565_s6 }
  0x73   : > { %s351_s5 = scalar_lea.sflag [#allocation6], %s350_s4 }
  0x74   : > { %2302 = dma.done.wait (%p2513_p0), %s351_s5, 128  }
  0x75   : > { %2304 = vsyncadd (%p2513_p0), %s351_s5, 4294967168  ;;  %p2778_p1 = scmp.eq.s32.totalorder %s2430_s30, 0 }
  0x77   : > { %2306 = dma.done.wait (%p2778_p1), [#allocation6], 512   ;;  %p2779_p3 = pmov %p2778_p1 }
  0x78   : > { %p2780_p9 = pmov %p2778_p1 }
  0x79   : > { %2308 = vsyncadd (%p2779_p3), [#allocation6], 4294966784 }
  0x7a   : > { %2310 = dma.done.wait (%p2780_p9), [#allocation9], 1024   ;;  %p2781_p10 = pmov %p2778_p1 }
  0x7b   : > { %p2782_p7 = pmov %p2778_p1 }
  0x7c   : > { %2312 = vsyncadd (%p2781_p10), [#allocation9], 4294966272 }
  0x7d   : > { %2314 = dma.done.wait (%p2782_p7), [#allocation12], 512   ;;  %p2783_p12 = pmov %p2778_p1 }
  0x7e   : > { %vm409_vm0 = vcmask 261120   ;;  %v425_v0 = vld [vmem:[%s354_s8] sm:$0xff]  ;;  %v2591_v1 = vld [vmem:[%s345_s14] sm:$0xff]  ;;  %v2353_v8 = vmov 0.0   ;;  %vm2354_vm1 = vmmov 0   ;;  %vm663_vm2 = vcmask 64512  }
  0x7f   : > { %2316 = vsyncadd (%p2783_p12), [#allocation12], 4294966784  ;;  %v426_v2 = vmul.f32 %v425_v0, %v425_v0  ;;  %v408_v3 = vmul.f32 %v2591_v1, %v2591_v1  ;;  %v515_v6 = vld [vmem:[#allocation8 + $0x18] sm:$0xff]  ;;  %1870 = vmatprep.subr.mxu1 %v2353_v8  ;;  %1859 = vmatprep.subr.mxu0 %v2353_v8  ;;  %v514_v9 = vld [vmem:[#allocation8 + $0x10] sm:$0xff]  ;;  %s2355_s19 = smov 120   ;;  %s2356_s17 = smov 112  }
  0x80   : > { %v438_v7 = vld [vmem:[#allocation7 + $0x18] sm:$0xff]  ;;  %v437_v10 = vld [vmem:[#allocation7 + $0x10] sm:$0xff]  ;;  %1871 = vmatpush3.msra.mxu1 %v515_v6  ;;  %v513_v11 = vld [vmem:[#allocation8 + $0x8] sm:$0xff]  ;;  %1878 = vmatprep.mubr.msk.f32.mxu1 %vm2354_vm1, %v2353_v8  ;;  %s2357_s12 = smov 104   ;;  %s1817_s13 = sshll.u32 %s2335_s27, 7 }
  0x81   : > { %v427_v4 = vsel %vm409_vm0, %v426_v2, 0.0  ;;  %v410_v5 = vsel %vm409_vm0, %v408_v3, 0.0  ;;  %1860 = vmatpush3.msra.mxu0 %v438_v7  ;;  %1872 = vmatprep.subr.mxu1 %v2353_v8  ;;  %v436_v12 = vld [vmem:[#allocation7 + $0x8] sm:$0xff]  ;;  %v512_v13 = vld [vmem:[#allocation8] sm:$0xff]  ;;  %v592_v28 = vld [vmem:[#allocation10 + $0x18] sm:$0xff]  ;;  %s405_s11 = scalar_lea.vmem [#allocation13], %s2565_s6  ;;  %s1633_s15 = scalar_lea.hbm %s2759_s7, %s1817_s13 }
  0x82   : > { %428 = vadd.xlane.f32.xlu0 %v427_v4  ;;  %1861 = vmatprep.subr.mxu0 %v2353_v8  ;;  %v435_v14 = vld [vmem:[#allocation7] sm:$0xff]  ;;  %v591_v29 = vld [vmem:[#allocation10 + $0x10] sm:$0xff]  ;;  %v590_v30 = vld [vmem:[#allocation10 + $0x8] sm:$0xff]  ;;  %s1635_s21 = sshll.u32 %s405_s11, 4  ;;  %s1621_s0 = scalar_lea.sflag [#allocation4], %s2562_s3  ;;  %s1636_s21 = int_to_ptr.vmem [resolvable:$true] %s1635_s21 }
  0x83   : > { %1873 = vmatpush3.msra.mxu1 %v514_v9  ;;  %1862 = vmatpush3.msra.mxu0 %v437_v10  ;;  %v1796_v22 = vld [vmem:[%s2754_s2] ss:$0 sm:$0xff]  ;;  %v991_v59 = vld [vmem:[#allocation11 + $0x8] sm:$0xff]  ;;  %s2247_s14 = scalar_lea.vmem %s1636_s21, 128  ;;  %s2358_s27 = smov [#allocation13]  }
  0x84   : > { %1874 = vmatprep.subr.mxu1 %v2353_v8  ;;  %1863 = vmatprep.subr.mxu0 %v2353_v8  ;;  %v589_v31 = vld [vmem:[#allocation10] sm:$0xff]  ;;  %p2248_p0 = scmp.ne.s32.totalorder %s1636_s21, %s2247_s14  ;;  %s2251_s6 = sshll.u32 %s2358_s27, 4  ;;  %s2252_s6 = int_to_ptr.vmem [resolvable:$false] %s2251_s6 }
  0x85   : > { %1875 = vmatpush3.msra.mxu1 %v513_v11  ;;  %1864 = vmatpush3.msra.mxu0 %v436_v12  ;;  %s2253_s4 = scalar_lea.vmem %s2252_s6, 256  ;;  %p2254_p11 = scmp.lt.s32.totalorder %s1636_s21, %s2252_s6 }
  0x86   : > { %411 = vadd.xlane.f32.xlu0 %v410_v5  ;;  %1876 = vmatprep.subr.mxu1 %v2353_v8  ;;  %p2249_p6 = pnand %p2248_p0, %p2517_p2  ;;  %p2255_p13 = scmp.lt.s32.totalorder %s2253_s4, %s2247_s14 }
  0x87   : > { %1877 = vmatpush3.msra.mxu1 %v512_v13  ;;  %1865 = vmatprep.subr.mxu0 %v2353_v8 }
  0x88   : > { %1867 = vmatprep.mubr.msk.f32.mxu0 %vm2354_vm1, %v2353_v8  ;;  %1892 = vmatprep.subr.mxu1 %v2353_v8  ;;  %p2250_p5 = pneg %p2249_p6  ;;  %p2256_p4 = por %p2255_p13, %p2254_p11 }
  0x89   : > { %1866 = vmatpush3.msra.mxu0 %v435_v14 }
  0x8a   : > { %1881 = vmatprep.subr.mxu0 %v2353_v8  ;;  %p2257_p1 = pnand %p2256_p4, %p2250_p5 }
 0x10b   : > { %v429_v15 = vpop.xlane.xlu0 %428 }
 0x10c   : > { %v430_v16 = vmul.f32 0.03125, %v429_v15 }
 0x10e   : > { %v431_v17 = vadd.f32 1e-06, %v430_v16 }
 0x10f   : > { %v412_v18 = vpop.xlane.xlu0 %411 }
 0x110   : > { %2067 = vrsqrt.f32 %v431_v17  ;;  %v414_v19 = vmul.f32 0.03125, %v412_v18 }
 0x112   : > { %v415_v20 = vadd.f32 1e-06, %v414_v19 }
 0x114   : > { %2069 = vrsqrt.f32 %v415_v20 }
 0x11d   : > { %v2068_v21 = vpop.eup %2067 }
 0x11e   : > { %v433_v23 = vmul.f32 %v2068_v21, %v425_v0  ;;  %v824_v0 = vld [vmem:[#allocation11] sm:$0xff] }
 0x120   : > { %v434_v24 = vmul.f32 %v1796_v22, %v433_v23 }
 0x121   : > { %v2070_v25 = vpop.eup %2069 }
 0x122   : > { %1879 = vmatmul.mubr.msk.f32.vlgmr.msra.gmra.mxu1 %vm409_vm0, %v434_v24  ;;  %v417_v26 = vmul.f32 %v2070_v25, %v2591_v1 }
 0x123   : > { %1894 = vmatprep.mubr.msk.f32.mxu1 %vm2354_vm1, %v2353_v8 }
 0x124   : > { %v424_v27 = vmul.f32 %v1796_v22, %v417_v26 }
 0x126   : > { %1868 = vmatmul.mubr.msk.f32.vlgmr.msra.gmra.mxu0 %vm409_vm0, %v424_v27  ;;  %v1303_v27 = vld [vmem:[#allocation11 + $0x10] sm:$0xff] }
 0x127   : > { %1882 = vmatpush3.msra.mxu0 %v592_v28  ;;  %1889 = vmatprep.mubr.msk.f32.mxu0 %vm2354_vm1, %v2353_v8 }
 0x128   : > { %1883 = vmatprep.subr.mxu0 %v2353_v8 }
 0x129   : > { %1884 = vmatpush3.msra.mxu0 %v591_v29 }
 0x12a   : > { %1885 = vmatprep.subr.mxu0 %v2353_v8 }
 0x12b   : > { %1886 = vmatpush3.msra.mxu0 %v590_v30 }
 0x12c   : > { %1887 = vmatprep.subr.mxu0 %v2353_v8 }
 0x12d   : > { %1888 = vmatpush3.msra.mxu0 %v589_v31 }
 0x12e   : > { %1890 = vmatmul.mubr.msk.f32.vlgmr.msra.gmra.mxu0 %vm409_vm0, %v434_v24  ;;  %1902 = vmatprep.subr.mxu0 %v2353_v8 }
 0x12f   : > { %1904 = vmatprep.mubr.msk.f32.mxu0 %vm2354_vm1, %v2353_v8 }
 0x1e2   : > { %v2628_v32 = vpop.f32.mrf.mxu1 }
 0x1e3   : > { %827 = vrot.lane.b32.xlu1 %v2628_v32, %s2355_s19  ;;  %1893 = vmatpush3.xpose.msk.msra.mxu1 %vm663_vm2, %v2628_v32 }
 0x1e4   : > { %v1880_v33 = vpop.f32.mrf.mxu1  ;;  %1897 = vmatprep.subr.mxu1 %v2353_v8 }
 0x1e6   : > { %v2635_v34 = vpop.f32.mrf.mxu0 }
 0x1e7   : > { %825 = vrot.lane.b32.xlu1 %v2635_v34, %s2355_s19  ;;  %1895 = vmatmul.mubr.msk.f32.vlgmr.msra.gmra.mxu1 %vm663_vm2, %v2635_v34 }
 0x1e8   : > { %v1869_v35 = vpop.f32.mrf.mxu0  ;;  %1899 = vmatprep.mubr.msk.f32.mxu1 %vm2354_vm1, %v2353_v8 }
 0x1ee   : > { %v2643_v36 = vpop.f32.mrf.mxu0 }
 0x1ef   : > { %1898 = vmatpush3.msra.mxu1 %v2643_v36 }
 0x1f0   : > { %v1891_v37 = vpop.f32.mrf.mxu0  ;;  %1907 = vmatprep.subr.mxu1 %v2353_v8 }
 0x255   : > { %v828_v38 = vpop.permute.xlu1 %827 }
 0x256   : > { %1903 = vmatpush3.xpose.msk.msra.mxu0 %vm663_vm2, %v828_v38 }
 0x257   : > { %1912 = vmatprep.subr.mxu0 %v2353_v8 }
 0x259   : > { %v826_v39 = vpop.permute.xlu1 %825 }
 0x25a   : > { %1905 = vmatmul.mubr.msk.f32.vlgmr.msra.gmra.mxu0 %vm663_vm2, %v826_v39 }
 0x25b   : > { %1914 = vmatprep.mubr.msk.f32.mxu0 %vm2354_vm1, %v2353_v8  ;;  %1913 = vmatpush3.msra.mxu0 %v991_v59 }
 0x25c   : > { %1922 = vmatprep.subr.mxu0 %v2353_v8 }
 0x2a7   : > { %v736_v40 = vpop.f32.mrf.mxu1 }
 0x2a8   : > { %v740_v41 = vsel %vm663_vm2, %v736_v40, -inf }
 0x2a9   : > { %741 = vmax.xlane.f32.xlu0 %v740_v41  ;;  %v1896_v42 = vpop.f32.mrf.mxu1 }
 0x31a   : > { %v899_v43 = vpop.f32.mrf.mxu0 }
 0x31b   : > { %v903_v44 = vsel %vm663_vm2, %v899_v43, -inf }
 0x31c   : > { %904 = vmax.xlane.f32.xlu1 %v903_v44  ;;  %v1906_v45 = vpop.f32.mrf.mxu0 }
 0x32d   : > { %1138 = vrot.lane.b32.xlu1 %v2635_v34, %s2356_s17 }
 0x332   : > { %v742_v46 = vpop.xlane.xlu0 %741 }
 0x333   : > { %v743_v47 = vsub.f32 %v736_v40, %v742_v46 }
 0x335   : > { %v744_v48 = vmul.f32 1.442695, %v743_v47 }
 0x337   : > { %2071 = vpow2.f32 %v744_v48 }
 0x344   : > { %v2072_v49 = vpop.eup %2071 }
 0x345   : > { %v746_v50 = vsel %vm663_vm2, %v2072_v49, 0.0 }
 0x346   : > { %747 = vadd.xlane.f32.xlu0 %v746_v50 }
 0x3a5   : > { %v905_v51 = vpop.xlane.xlu1 %904 }
 0x3a6   : > { %v906_v52 = vsub.f32 %v899_v43, %v905_v51 }
 0x3a8   : > { %v907_v53 = vmul.f32 1.442695, %v906_v52 }
 0x3a9   : > { %v1139_v7 = vpop.permute.xlu1 %1138 }
 0x3aa   : > { %2073 = vpow2.f32 %v907_v53 }
 0x3b7   : > { %v2074_v54 = vpop.eup %2073 }
 0x3b8   : > { %v909_v55 = vsel %vm663_vm2, %v2074_v54, 0.0 }
 0x3b9   : > { %910 = vadd.xlane.f32.xlu0 %v909_v55 }
 0x3cf   : > { %v748_v56 = vpop.xlane.xlu0 %747  ;;  %915 = vrot.lane.b32.xlu0 %v2643_v36, %s2355_s19 }
 0x3d0   : > { %2075 = vrcp.f32 %v748_v56 }
 0x3d3   : > { %1140 = vrot.lane.b32.xlu0 %v2628_v32, %s2356_s17 }
 0x3dd   : > { %v2076_v57 = vpop.eup %2075 }
 0x3de   : > { %v750_v58 = vmul.f32 %v2076_v57, %v2072_v49 }
 0x3e0   : > { %1900 = vmatmul.mubr.msk.f32.vlgmr.msra.gmra.mxu1 %vm663_vm2, %v750_v58 }
 0x3e1   : > { %1909 = vmatprep.mubr.msk.f32.mxu1 %vm2354_vm1, %v2353_v8 }
 0x442   : > { %v911_v60 = vpop.xlane.xlu0 %910 }
 0x443   : > { %2077 = vrcp.f32 %v911_v60 }
 0x446   : > { %v916_v61 = vpop.permute.xlu0 %915 }
 0x447   : > { %1908 = vmatpush3.msra.mxu1 %v916_v61 }
 0x448   : > { %1917 = vmatprep.subr.mxu1 %v2353_v8 }
 0x44a   : > { %v1141_v5 = vpop.permute.xlu0 %1140 }
 0x450   : > { %v2078_v62 = vpop.eup %2077 }
 0x451   : > { %v913_v63 = vmul.f32 %v2078_v62, %v2074_v54 }
 0x453   : > { %1910 = vmatmul.mubr.msk.f32.vlgmr.msra.gmra.mxu1 %vm663_vm2, %v913_v63 }
 0x454   : > { %1918 = vmatpush3.msra.mxu1 %v824_v0  ;;  %1919 = vmatprep.mubr.msk.f32.mxu1 %vm2354_vm1, %v2353_v8 }
 0x455   : > { %1927 = vmatprep.subr.mxu1 %v2353_v8 }
 0x4a0   : > { %v820_v2 = vpop.f32.mrf.mxu1 }
 0x4a1   : > { %1920 = vmatmul.mubr.msk.f32.vlgmr.msra.gmra.mxu1 %vm663_vm2, %v820_v2 }
 0x4a2   : > { %v1901_v3 = vpop.f32.mrf.mxu1  ;;  %1929 = vmatprep.mubr.msk.f32.mxu1 %vm2354_vm1, %v2353_v8 }
 0x513   : > { %v987_v4 = vpop.f32.mrf.mxu1 }
 0x514   : > { %1915 = vmatmul.mubr.msk.f32.vlgmr.msra.gmra.mxu0 %vm663_vm2, %v987_v4 }
 0x515   : > { %1923 = vmatpush3.xpose.msk.msra.mxu0 %vm663_vm2, %v1141_v5  ;;  %v1911_v6 = vpop.f32.mrf.mxu1  ;;  %1924 = vmatprep.mubr.msk.f32.mxu0 %vm2354_vm1, %v2353_v8 }
 0x516   : > { %1932 = vmatprep.subr.mxu0 %v2353_v8 }
 0x518   : > { %1925 = vmatmul.mubr.msk.f32.vlgmr.msra.gmra.mxu0 %vm663_vm2, %v1139_v7 }
 0x519   : > { %1934 = vmatprep.mubr.msk.f32.mxu0 %vm2354_vm1, %v2353_v8  ;;  %1933 = vmatpush3.msra.mxu0 %v1303_v27 }
 0x51a   : > { %1942 = vmatprep.subr.mxu0 %v2353_v8 }
 0x561   : > { %v1134_v9 = vpop.f32.mrf.mxu1 }
 0x563   : > { %v1921_v10 = vpop.f32.mrf.mxu1 }
 0x5d4   : > { %v1061_v11 = vpop.f32.mrf.mxu0 }
 0x5d5   : > { %v1135_v40 = vadd.f32 %v1134_v9, %v1061_v11 }
 0x5d6   : > { %v1916_v12 = vpop.f32.mrf.mxu0 }
 0x5d8   : > { %v1212_v13 = vpop.f32.mrf.mxu0 }
 0x5d9   : > { %v1216_v14 = vsel %vm663_vm2, %v1212_v13, -inf }
 0x5da   : > { %1217 = vmax.xlane.f32.xlu0 %v1216_v14  ;;  %v1926_v15 = vpop.f32.mrf.mxu0 }
 0x5f0   : > { %1227 = vrot.lane.b32.xlu0 %v2643_v36, %s2356_s17 }
 0x5f4   : > { %1378 = vrot.lane.b32.xlu0 %v2635_v34, %s2357_s12 }
 0x663   : > { %v1218_v16 = vpop.xlane.xlu0 %1217 }
 0x664   : > { %v1219_v17 = vsub.f32 %v1212_v13, %v1218_v16 }
 0x666   : > { %v1220_v18 = vmul.f32 1.442695, %v1219_v17 }
 0x667   : > { %v1228_v19 = vpop.permute.xlu0 %1227 }
 0x668   : > { %2079 = vpow2.f32 %v1220_v18  ;;  %1928 = vmatpush3.msra.mxu1 %v1228_v19 }
 0x669   : > { %1937 = vmatprep.subr.mxu1 %v2353_v8 }
 0x66b   : > { %v1379_v26 = vpop.permute.xlu0 %1378 }
 0x675   : > { %v2080_v20 = vpop.eup %2079 }
 0x676   : > { %v1222_v21 = vsel %vm663_vm2, %v2080_v20, 0.0 }
 0x677   : > { %1223 = vadd.xlane.f32.xlu1 %v1222_v21 }
 0x688   : > { %1380 = vrot.lane.b32.xlu1 %v2628_v32, %s2357_s12 }
 0x700   : > { %v1224_v22 = vpop.xlane.xlu1 %1223 }
 0x701   : > { %2081 = vrcp.f32 %v1224_v22 }
 0x704   : > { %v1381_v25 = vpop.permute.xlu1 %1380 }
 0x70e   : > { %v2082_v23 = vpop.eup %2081 }
 0x70f   : > { %v1226_v24 = vmul.f32 %v2082_v23, %v2080_v20 }
 0x711   : > { %1930 = vmatmul.mubr.msk.f32.vlgmr.msra.gmra.mxu1 %vm663_vm2, %v1226_v24 }
 0x712   : > { %1938 = vmatpush3.xpose.msk.msra.mxu1 %vm663_vm2, %v1381_v25  ;;  %1939 = vmatprep.mubr.msk.f32.mxu1 %vm2354_vm1, %v2353_v8 }
 0x713   : > { %1947 = vmatprep.subr.mxu1 %v2353_v8 }
 0x715   : > { %1940 = vmatmul.mubr.msk.f32.vlgmr.msra.gmra.mxu1 %vm663_vm2, %v1379_v26 }
 0x716   : > { %1949 = vmatprep.mubr.msk.f32.mxu1 %vm2354_vm1, %v2353_v8 }
 0x7d1   : > { %v1299_v28 = vpop.f32.mrf.mxu1 }
 0x7d2   : > { %1935 = vmatmul.mubr.msk.f32.vlgmr.msra.gmra.mxu0 %vm663_vm2, %v1299_v28 }
 0x7d3   : > { %v1931_v29 = vpop.f32.mrf.mxu1  ;;  %1944 = vmatprep.mubr.msk.f32.mxu0 %vm2354_vm1, %v2353_v8  ;;  %v1543_v8 = vld [vmem:[#allocation11 + $0x18] sm:$0xff] }
 0x7d4   : > { %1948 = vmatpush3.msra.mxu1 %v1543_v8 }
 0x7d5   : > { %v1452_v30 = vpop.f32.mrf.mxu1 }
 0x7d6   : > { %v1456_v31 = vsel %vm663_vm2, %v1452_v30, -inf }
 0x7d7   : > { %1457 = vmax.xlane.f32.xlu0 %v1456_v31  ;;  %v1941_v32 = vpop.f32.mrf.mxu1 }
 0x7ed   : > { %1467 = vrot.lane.b32.xlu0 %v2643_v36, %s2357_s12 }
 0x860   : > { %v1458_v33 = vpop.xlane.xlu0 %1457 }
 0x861   : > { %v1459_v34 = vsub.f32 %v1452_v30, %v1458_v33 }
 0x863   : > { %v1460_v35 = vmul.f32 1.442695, %v1459_v34 }
 0x864   : > { %v1468_v37 = vpop.permute.xlu0 %1467 }
 0x865   : > { %2083 = vpow2.f32 %v1460_v35  ;;  %1943 = vmatpush3.msra.mxu0 %v1468_v37 }
 0x872   : > { %v2084_v38 = vpop.eup %2083 }
 0x873   : > { %v1462_v39 = vsel %vm663_vm2, %v2084_v38, 0.0 }
 0x874   : > { %1463 = vadd.xlane.f32.xlu1 %v1462_v39 }
 0x892   : > { %v1373_v41 = vpop.f32.mrf.mxu0 }
 0x893   : > { %v1377_v42 = vadd.f32 %v1373_v41, %v1135_v40 }
 0x894   : > { %v1936_v43 = vpop.f32.mrf.mxu0 }
 0x8fd   : > { %v1464_v44 = vpop.xlane.xlu1 %1463 }
 0x8fe   : > { %2085 = vrcp.f32 %v1464_v44 }
 0x90b   : > { %v2086_v36 = vpop.eup %2085 }
 0x90c   : > { %v1466_v45 = vmul.f32 %v2086_v36, %v2084_v38 }
 0x90e   : > { %1945 = vmatmul.mubr.msk.f32.vlgmr.msra.gmra.mxu0 %vm663_vm2, %v1466_v45 }
 0x9ce   : > { %v1539_v46 = vpop.f32.mrf.mxu0 }
 0x9cf   : > { %1950 = vmatmul.mubr.msk.f32.vlgmr.msra.gmra.mxu1 %vm663_vm2, %v1539_v46 }
 0x9d0   : > { %v1946_v47 = vpop.f32.mrf.mxu0 }
 0xa8f   : > { %v1613_v48 = vpop.f32.mrf.mxu1 }
 0xa90   : > { %v1617_v49 = vadd.f32 %v1613_v48, %v1377_v42 }
 0xa91   : > { %v1951_v50 = vpop.f32.mrf.mxu1 }
 0xa92   : > { %v1618_v51 = vadd.f32 %v1617_v49, %v2591_v1 }
 0xa94   : > { %1619 = vst.msk [vmem:[%s405_s11] sm:$0xff] %vm409_vm0, %v1618_v51 }
 0xa95   : > { %2260 = shalt.err (!%p2257_p1)
}
 0xa96   : > { %s2261_s5 = scalar_lea.hbm %s1633_s15, 128  ;;  %s2265_s30 = scalar_lea.hbm %s2759_s7, 256 }
 0xa97   : > { %p2262_p3 = scmp.ne.s32.totalorder %s1633_s15, %s2261_s5  ;;  %p2266_p7 = scmp.lt.s32.totalorder %s1633_s15, %s2759_s7 }
 0xa98   : > { %p2267_p12 = scmp.lt.s32.totalorder %s2265_s30, %s2261_s5 }
 0xa99   : > { %p2263_p9 = pnand %p2262_p3, %p2517_p2 }
 0xa9a   : > { %p2268_p0 = por %p2267_p12, %p2266_p7 }
 0xa9b   : > { %p2264_p10 = pneg %p2263_p9 }
 0xa9d   : > { %p2269_p6 = pnand %p2268_p0, %p2264_p10 }
 0xa9f   : > { %2272 = shalt.err (!%p2269_p6)
}
 0xaa0   : > { %1972 = dma.vmem_to_hbm [thread:$0]  (%p2517_p2), %s1636_s21, 128, %s1633_s15, %s1621_s0  }
 0xaa1 PF: > { %s1647_s17 = sand.u32 1, %s2323_s24   ;;  %p2784_p5 = scmp.ge.s32.totalorder %s2343_s29, 2 }
 0xaa2   : > { %s1648_s12 = scalar_lea.sflag [#allocation4], %s1647_s17 }
 0xaa3   : > { %p1995_p11 = pnand %p2784_p5, %p2524_p8 }
 0xaa5   : > { %p1996_p13 = pneg %p1995_p11 }
 0xaa7   : > { %2318 = dma.done.wait (%p1996_p13), %s1648_s12, 128  }
 0xaa8   : > { %2320 = vsyncadd (%p1996_p13), %s1648_s12, 4294967168  ;;  %s28_s29 = sadd.s32 1, %s2343_s29   ;;  %s2785_s24 = smov %s2327_s25 }
 0xaa9   : > { %p25_p4 = scmp.ge.s32.totalorder %s28_s29, 4   ;;  %s2786_s25 = smov %s2331_s26 }
 0xaaa   : > { %s2787_s26 = smov %s2522_s9  ;;  %s2788_s27 = smov %s2339_s28 }
 0xaab   : > { %s2789_s28 = smov %s2791_s20  ;;  %27 = sbr.rel (!%p25_p4) target bundleno = 16 (0x10), region = 122 }
 0xab0   :  { %1653 = vsyncpa [#allocation3], 1 }
 0xab1   :  { %1655 = vsyncpa [#allocation3 + $0x1], 1 }
 0xab2   :  { %1656 = vsyncpa [#allocation6], 1 }
 0xab3   :  { %1658 = vsyncpa [#allocation6 + $0x1], 1 }
 0xab4   :  { %1659 = vsyncpa [#allocation9], 1 }
 0xab5   :  { %1660 = vsyncpa [#allocation12], 1 }
 0xab6   :  { %1661 = vsyncpa [#allocation4], 1 }
 0xab7   :  { %1663 = vsyncpa [#allocation4 + $0x1], 1 }

</bundles_post_ra>
